<compile_context>
chip_gen: v5e
topology: v5e:2x2
jax: 0.10.0
libtpu: 0.0.40
codegen_flags: <defaults>
</compile_context>

<pallas_src>
import math

import jax
import jax.numpy as jnp
from jax import lax
from jax.experimental import pallas as pl
from jax.experimental.pallas import tpu as pltpu


# ----------------------------- model config -----------------------------
EMBED_DIM = 32
N_HEADS = 8
HEAD_DIM = EMBED_DIM // N_HEADS
EXPANSION = 4
HIDDEN_DIM = EXPANSION * EMBED_DIM
BATCH = 2
SEQ = 8
LN_EPS = 1e-5
NEG_INF = -1e30


# ----------------------------- Pallas kernel -----------------------------
def _make_kernel(B, S, E, n_heads, hidden):
    R = B * S                  # flattened (batch*seq) rows
    HR = n_heads * R           # head-expanded rows
    F = hidden
    assert n_heads & (n_heads - 1) == 0, "n_heads must be a power of two"

    def mxu(a, b):
        # bf16 operands, f32 accumulation (MXU-native).
        return jnp.dot(a.astype(jnp.bfloat16), b.astype(jnp.bfloat16),
                       preferred_element_type=jnp.float32)

    def mxu_t(a, b):
        # a @ b.T with bf16 operands, f32 accumulation.
        return lax.dot_general(a.astype(jnp.bfloat16), b.astype(jnp.bfloat16),
                               (((1,), (1,)), ((), ())),
                               preferred_element_type=jnp.float32)

    def kernel(k_ref, q_ref, v_ref, w_ref, vec_ref, const_ref, out_ref):
        k_in = k_ref[...]          # (R, E) f32
        q_in = q_ref[...]
        v_in = v_ref[...]

        # ---- static, tile-aligned slices of the packed bf16 weight slab (6E, F)
        wq = w_ref[0:E, 0:E]              # softmax scale already folded in
        wk = w_ref[E:2 * E, 0:E]
        wv = w_ref[2 * E:3 * E, 0:E]
        wo = w_ref[3 * E:4 * E, 0:E]
        w1 = w_ref[4 * E:5 * E, :]        # (E, F)
        w2t = w_ref[5 * E:6 * E, :]       # (E, F) == w2^T

        # ---- packed bias / LayerNorm vectors (f32, one (8,F) slab)
        bo = vec_ref[0:1, 0:E]
        g1 = vec_ref[1:2, 0:E]
        be1 = vec_ref[2:3, 0:E]
        g2 = vec_ref[3:4, 0:E]
        be2 = vec_ref[4:5, 0:E]
        bf2 = vec_ref[5:6, 0:E]
        bf1 = vec_ref[6:7, :]

        # ---- precomputed static masks (no in-kernel iota/compare/cast)
        head_mask = const_ref[0:HR, :]            # (HR, E) 0/1
        score_bias = const_ref[HR:2 * HR, 0:R]    # (HR, R) 0 / -1e30 (cross-batch)

        # ---- fused per-head projections: block-diagonal (E, E) weights
        qp = mxu(q_in, wq)                        # (R, E), columns [hd*h : hd*(h+1)] = head h
        kp = mxu(k_in, wk)
        vp = mxu(v_in, wv)

        # ---- head-major expansion: row h*R + r keeps only head h's lanes of qp[r]
        q_exp = jnp.concatenate([qp] * n_heads, axis=0) * head_mask      # (HR, E)

        # ---- scores for every (head, query-row) against all R keys; cross-batch masked
        scores = mxu_t(q_exp, kp) + score_bias                           # (HR, R)

        # ---- softmax per row (exact max subtraction)
        m = jnp.max(scores, axis=-1, keepdims=True)
        e = jnp.exp(scores - m)
        denom = jnp.sum(e, axis=-1, keepdims=True)
        attn = e * pl.reciprocal(denom, approx=True)                     # (HR, R)

        # ---- attention-weighted values, masked to each head's lanes
        ctx_full = mxu(attn, vp) * head_mask                             # (HR, E)

        # ---- exact head collapse: head lanes are disjoint, so summing the head-major
        #      row blocks selects each head's contribution (3 halving adds, no matmul).
        acc = ctx_full
        rows = HR
        while rows > R:
            half = rows // 2
            acc = acc[:half, :] + acc[half:, :]
            rows = half
        ctx = acc                                                        # (R, E)

        attn_out = mxu(ctx, wo) + bo                                     # (R, E)

        # ---- residual + LayerNorm1 (f32)
        x = attn_out + v_in
        mean1 = jnp.mean(x, axis=-1, keepdims=True)
        var1 = jnp.mean((x - mean1) ** 2, axis=-1, keepdims=True)
        n1 = (x - mean1) * lax.rsqrt(var1 + LN_EPS) * g1 + be1

        # ---- feed-forward
        hid = jnp.maximum(mxu(n1, w1) + bf1, 0.0)                        # (R, F)
        ff = mxu_t(hid, w2t) + bf2                                       # (R, E)

        # ---- residual + LayerNorm2 (f32)
        y = ff + n1
        mean2 = jnp.mean(y, axis=-1, keepdims=True)
        var2 = jnp.mean((y - mean2) ** 2, axis=-1, keepdims=True)
        out = (y - mean2) * lax.rsqrt(var2 + LN_EPS) * g2 + be2

        # NOTE: E=32 < 128 lanes -> masked vst; lane-dense repack intentionally skipped.
        out_ref[...] = out.astype(out_ref.dtype)

    return kernel


# ----------------------------- one-time parameter packing -----------------------------
def prepare_params(params, B=BATCH, S=SEQ):
    """Hoisted out of the hot path: kron, bf16 casts, slab packing, static masks."""
    (wk, wq, wv, wo, bo, g1, be1, g2, be2, w1, bf1, w2, bf2) = params
    E, H, Hd, F = EMBED_DIM, N_HEADS, HEAD_DIM, HIDDEN_DIM
    R, HR = B * S, N_HEADS * B * S
    assert F >= E and R <= E

    scale = 1.0 / math.sqrt(Hd)
    eye = jnp.eye(H, dtype=jnp.float32)
    wq_bd = jnp.kron(eye, wq * scale)      # softmax scale folded into Q weights (f32)
    wk_bd = jnp.kron(eye, wk)
    wv_bd = jnp.kron(eye, wv)

    # (6E, F) bf16 weight slab: [wq_bd | wk_bd | wv_bd | wo (lane-padded); w1; w2^T]
    wslab = jnp.zeros((6 * E, F), jnp.float32)
    wslab = wslab.at[0:E, 0:E].set(wq_bd)
    wslab = wslab.at[E:2 * E, 0:E].set(wk_bd)
    wslab = wslab.at[2 * E:3 * E, 0:E].set(wv_bd)
    wslab = wslab.at[3 * E:4 * E, 0:E].set(wo)
    wslab = wslab.at[4 * E:5 * E, :].set(w1)
    wslab = wslab.at[5 * E:6 * E, :].set(w2.T)
    wslab = wslab.astype(jnp.bfloat16)

    # (8, F) f32 vector slab: bo, g1, be1, g2, be2, bf2 (E lanes), bf1 (F lanes)
    vecslab = jnp.zeros((8, F), jnp.float32)
    for i, vec in enumerate((bo, g1, be1, g2, be2, bf2)):
        vecslab = vecslab.at[i:i + 1, 0:E].set(vec.reshape(1, E))
    vecslab = vecslab.at[6:7, :].set(bf1.reshape(1, F))

    # (2*HR, E) f32 constant slab: head lane mask + cross-batch additive score bias
    row = jnp.arange(HR)
    head_of_row = row // R
    lane_head = jnp.arange(E) // Hd
    head_mask = (head_of_row[:, None] == lane_head[None, :]).astype(jnp.float32)
    q_batch = (row % R) // S
    k_batch = jnp.arange(R) // S
    bias = jnp.where(q_batch[:, None] == k_batch[None, :],
                     jnp.float32(0.0), jnp.float32(NEG_INF))
    bias_pad = jnp.zeros((HR, E), jnp.float32).at[:, 0:R].set(bias)
    constslab = jnp.concatenate([head_mask, bias_pad], axis=0)

    return wslab, vecslab, constslab


# ----------------------------- per-call wrapper -----------------------------
def transformer_block(key, query, value, packed):
    wslab, vecslab, constslab = packed
    B, S, E = key.shape
    kernel = _make_kernel(B, S, E, N_HEADS, HIDDEN_DIM)
    vmem = pl.BlockSpec(memory_space=pltpu.MemorySpace.VMEM)

    out_flat = pl.pallas_call(
        kernel,
        out_shape=jax.ShapeDtypeStruct((B * S, E), jnp.float32),
        in_specs=[vmem] * 6,
        out_specs=vmem,
    )(
        key.reshape(B * S, E), query.reshape(B * S, E), value.reshape(B * S, E),
        wslab, vecslab, constslab,
    )
    return out_flat.reshape(B, S, E)


# ----------------------------- pure-JAX reference (f32) -----------------------------
def transformer_block_ref(key, query, value, params):
    (wk, wq, wv, wo, bo, g1, be1, g2, be2, w1, bf1, w2, bf2) = params
    B, S, E = key.shape
    kh = key.reshape(B, S, N_HEADS, HEAD_DIM) @ wk
    qh = query.reshape(B, S, N_HEADS, HEAD_DIM) @ wq
    vh = value.reshape(B, S, N_HEADS, HEAD_DIM) @ wv
    qh, kh, vh = (t.transpose(0, 2, 1, 3) for t in (qh, kh, vh))      # (B, H, S, Hd)
    prod = jnp.einsum("bhqd,bhkd->bhqk", qh, kh) / math.sqrt(HEAD_DIM)
    attn = jax.nn.softmax(prod, axis=-1)
    ctx = jnp.einsum("bhqk,bhkd->bhqd", attn, vh)
    concat = ctx.transpose(0, 2, 1, 3).reshape(B, S, E)
    attn_out = concat @ wo + bo

    def ln(x, g, b):
        m = x.mean(-1, keepdims=True)
        v = ((x - m) ** 2).mean(-1, keepdims=True)
        return (x - m) * jax.lax.rsqrt(v + LN_EPS) * g + b

    x = attn_out + value
    n1 = ln(x, g1, be1)
    ff = jnp.maximum(n1 @ w1 + bf1, 0.0) @ w2 + bf2
    return ln(ff + n1, g2, be2)


# ----------------------------- main -----------------------------
if __name__ == "__main__":
    root = jax.random.PRNGKey(0)
    ks = jax.random.split(root, 12)

    # deterministic parameter init (PyTorch-equivalent shapes, pre-transposed to (in, out))
    wk = 0.1 * jax.random.normal(ks[0], (HEAD_DIM, HEAD_DIM), jnp.float32)
    wq = 0.1 * jax.random.normal(ks[1], (HEAD_DIM, HEAD_DIM), jnp.float32)
    wv = 0.1 * jax.random.normal(ks[2], (HEAD_DIM, HEAD_DIM), jnp.float32)
    wo = 0.1 * jax.random.normal(ks[3], (EMBED_DIM, EMBED_DIM), jnp.float32)
    bo = 0.1 * jax.random.normal(ks[4], (1, EMBED_DIM), jnp.float32)
    g1 = jnp.ones((1, EMBED_DIM), jnp.float32)
    be1 = jnp.zeros((1, EMBED_DIM), jnp.float32)
    g2 = jnp.ones((1, EMBED_DIM), jnp.float32)
    be2 = jnp.zeros((1, EMBED_DIM), jnp.float32)
    w1 = 0.1 * jax.random.normal(ks[5], (EMBED_DIM, HIDDEN_DIM), jnp.float32)
    bf1 = 0.1 * jax.random.normal(ks[6], (1, HIDDEN_DIM), jnp.float32)
    w2 = 0.1 * jax.random.normal(ks[7], (HIDDEN_DIM, EMBED_DIM), jnp.float32)
    bf2 = 0.1 * jax.random.normal(ks[8], (1, EMBED_DIM), jnp.float32)
    params = (wk, wq, wv, wo, bo, g1, be1, g2, be2, w1, bf1, w2, bf2)

    key_in = jax.random.normal(ks[9], (BATCH, SEQ, EMBED_DIM), jnp.float32)
    query_in = jax.random.normal(ks[10], (BATCH, SEQ, EMBED_DIM), jnp.float32)
    value_in = jax.random.normal(ks[11], (BATCH, SEQ, EMBED_DIM), jnp.float32)

    # One-time prep (kron / casts / slab packing / static masks) hoisted out of the hot path.
    packed = prepare_params(params)
    packed = jax.block_until_ready(packed)

    tb = jax.jit(transformer_block)
    out = tb(key_in, query_in, value_in, packed)
    jax.block_until_ready(out)

    ref = transformer_block_ref(key_in, query_in, value_in, params)
    assert out.shape == (BATCH, SEQ, EMBED_DIM)
    # bf16 matmul operands (f32 accumulation) -> slightly looser tolerance vs f32 reference.
    assert jnp.allclose(out, ref, atol=2e-2, rtol=2e-2), "mismatch vs reference"

    print("KERNEL_OK")
</pallas_src>

<mosaic_0001>
module attributes {stable_mosaic.version = 11 : i64} {
  func.func @kernel(%arg0: memref<16x32xf32, #tpu.memory_space<vmem>>, %arg1: memref<16x32xf32, #tpu.memory_space<vmem>>, %arg2: memref<16x32xf32, #tpu.memory_space<vmem>>, %arg3: memref<192x128xbf16, #tpu.memory_space<vmem>>, %arg4: memref<8x128xf32, #tpu.memory_space<vmem>>, %arg5: memref<256x32xf32, #tpu.memory_space<vmem>>, %arg6: memref<16x32xf32, #tpu.memory_space<vmem>>) attributes {dimension_semantics = [], scalar_prefetch = 0 : i64, scratch_operands = 0 : i64, tpu.core_type = #tpu.core_type<tc>} {
    %c0 = arith.constant 0 : index
    %c0_0 = arith.constant 0 : index
    %0 = vector.load %arg0[%c0, %c0_0] : memref<16x32xf32, #tpu.memory_space<vmem>>, vector<16x32xf32>
    %c0_1 = arith.constant 0 : index
    %c0_2 = arith.constant 0 : index
    %1 = vector.load %arg1[%c0_1, %c0_2] : memref<16x32xf32, #tpu.memory_space<vmem>>, vector<16x32xf32>
    %c0_3 = arith.constant 0 : index
    %c0_4 = arith.constant 0 : index
    %2 = vector.load %arg2[%c0_3, %c0_4] : memref<16x32xf32, #tpu.memory_space<vmem>>, vector<16x32xf32>
    %c0_5 = arith.constant 0 : index
    %c0_6 = arith.constant 0 : index
    %3 = vector.load %arg3[%c0_5, %c0_6] : memref<192x128xbf16, #tpu.memory_space<vmem>>, vector<32x32xbf16>
    %c32 = arith.constant 32 : index
    %c0_7 = arith.constant 0 : index
    %4 = vector.load %arg3[%c32, %c0_7] : memref<192x128xbf16, #tpu.memory_space<vmem>>, vector<32x32xbf16>
    %c64 = arith.constant 64 : index
    %c0_8 = arith.constant 0 : index
    %5 = vector.load %arg3[%c64, %c0_8] : memref<192x128xbf16, #tpu.memory_space<vmem>>, vector<32x32xbf16>
    %c96 = arith.constant 96 : index
    %c0_9 = arith.constant 0 : index
    %6 = vector.load %arg3[%c96, %c0_9] : memref<192x128xbf16, #tpu.memory_space<vmem>>, vector<32x32xbf16>
    %c128 = arith.constant 128 : index
    %c0_10 = arith.constant 0 : index
    %7 = vector.load %arg3[%c128, %c0_10] : memref<192x128xbf16, #tpu.memory_space<vmem>>, vector<32x128xbf16>
    %c160 = arith.constant 160 : index
    %c0_11 = arith.constant 0 : index
    %8 = vector.load %arg3[%c160, %c0_11] : memref<192x128xbf16, #tpu.memory_space<vmem>>, vector<32x128xbf16>
    %c0_12 = arith.constant 0 : index
    %c0_13 = arith.constant 0 : index
    %9 = vector.load %arg4[%c0_12, %c0_13] : memref<8x128xf32, #tpu.memory_space<vmem>>, vector<1x32xf32>
    %c1 = arith.constant 1 : index
    %c0_14 = arith.constant 0 : index
    %10 = vector.load %arg4[%c1, %c0_14] : memref<8x128xf32, #tpu.memory_space<vmem>>, vector<1x32xf32>
    %c2 = arith.constant 2 : index
    %c0_15 = arith.constant 0 : index
    %11 = vector.load %arg4[%c2, %c0_15] : memref<8x128xf32, #tpu.memory_space<vmem>>, vector<1x32xf32>
    %c3 = arith.constant 3 : index
    %c0_16 = arith.constant 0 : index
    %12 = vector.load %arg4[%c3, %c0_16] : memref<8x128xf32, #tpu.memory_space<vmem>>, vector<1x32xf32>
    %c4 = arith.constant 4 : index
    %c0_17 = arith.constant 0 : index
    %13 = vector.load %arg4[%c4, %c0_17] : memref<8x128xf32, #tpu.memory_space<vmem>>, vector<1x32xf32>
    %c5 = arith.constant 5 : index
    %c0_18 = arith.constant 0 : index
    %14 = vector.load %arg4[%c5, %c0_18] : memref<8x128xf32, #tpu.memory_space<vmem>>, vector<1x32xf32>
    %c6 = arith.constant 6 : index
    %c0_19 = arith.constant 0 : index
    %15 = vector.load %arg4[%c6, %c0_19] : memref<8x128xf32, #tpu.memory_space<vmem>>, vector<1x128xf32>
    %c0_20 = arith.constant 0 : index
    %c0_21 = arith.constant 0 : index
    %16 = vector.load %arg5[%c0_20, %c0_21] : memref<256x32xf32, #tpu.memory_space<vmem>>, vector<128x32xf32>
    %c128_22 = arith.constant 128 : index
    %c0_23 = arith.constant 0 : index
    %17 = vector.load %arg5[%c128_22, %c0_23] : memref<256x32xf32, #tpu.memory_space<vmem>>, vector<128x16xf32>
    %18 = arith.truncf %1 : vector<16x32xf32> to vector<16x32xbf16>
    %cst = arith.constant dense<0.000000e+00> : vector<16x32xf32>
    %19 = tpu.matmul %18, %3, %cst {dimension_numbers = #tpu.dot_dimension_numbers<[1], [0], [0], [1], [0, 0, 1, 1], [], []>} : vector<16x32xbf16>, vector<32x32xbf16>, vector<16x32xf32> -> vector<16x32xf32>
    %20 = arith.truncf %0 : vector<16x32xf32> to vector<16x32xbf16>
    %cst_24 = arith.constant dense<0.000000e+00> : vector<16x32xf32>
    %21 = tpu.matmul %20, %4, %cst_24 {dimension_numbers = #tpu.dot_dimension_numbers<[1], [0], [0], [1], [0, 0, 1, 1], [], []>} : vector<16x32xbf16>, vector<32x32xbf16>, vector<16x32xf32> -> vector<16x32xf32>
    %22 = arith.truncf %2 : vector<16x32xf32> to vector<16x32xbf16>
    %cst_25 = arith.constant dense<0.000000e+00> : vector<16x32xf32>
    %23 = tpu.matmul %22, %5, %cst_25 {dimension_numbers = #tpu.dot_dimension_numbers<[1], [0], [0], [1], [0, 0, 1, 1], [], []>} : vector<16x32xbf16>, vector<32x32xbf16>, vector<16x32xf32> -> vector<16x32xf32>
    %24 = tpu.concatenate %19, %19, %19, %19, %19, %19, %19, %19 in 0 : vector<16x32xf32>, vector<16x32xf32>, vector<16x32xf32>, vector<16x32xf32>, vector<16x32xf32>, vector<16x32xf32>, vector<16x32xf32>, vector<16x32xf32> -> vector<128x32xf32>
    %25 = arith.mulf %24, %16 : vector<128x32xf32>
    %26 = arith.truncf %25 : vector<128x32xf32> to vector<128x32xbf16>
    %27 = arith.truncf %21 : vector<16x32xf32> to vector<16x32xbf16>
    %cst_26 = arith.constant dense<0.000000e+00> : vector<128x16xf32>
    %28 = tpu.matmul %26, %27, %cst_26 {dimension_numbers = #tpu.dot_dimension_numbers<[1], [1], [0], [0], [0, 0, 1, 0], [], []>} : vector<128x32xbf16>, vector<16x32xbf16>, vector<128x16xf32> -> vector<128x16xf32>
    %29 = arith.addf %28, %17 : vector<128x16xf32>
    %cst_27 = arith.constant dense<0xFF800000> : vector<128xf32>
    %30 = vector.multi_reduction <maximumf>, %29, %cst_27 [1] : vector<128x16xf32> to vector<128xf32>
    %31 = vector.shape_cast %30 : vector<128xf32> to vector<128x1xf32>
    %32 = vector.broadcast %31 : vector<128x1xf32> to vector<128x16xf32>
    %33 = arith.subf %29, %32 : vector<128x16xf32>
    %34 = math.exp %33 : vector<128x16xf32>
    %cst_28 = arith.constant dense<0.000000e+00> : vector<128xf32>
    %35 = vector.multi_reduction <add>, %34, %cst_28 [1] : vector<128x16xf32> to vector<128xf32>
    %36 = vector.shape_cast %35 : vector<128xf32> to vector<128x1xf32>
    %37 = tpu.reciprocal %36 {approx = true} : vector<128x1xf32> -> vector<128x1xf32>
    %38 = vector.broadcast %37 : vector<128x1xf32> to vector<128x16xf32>
    %39 = arith.mulf %34, %38 : vector<128x16xf32>
    %40 = arith.truncf %39 : vector<128x16xf32> to vector<128x16xbf16>
    %41 = arith.truncf %23 : vector<16x32xf32> to vector<16x32xbf16>
    %cst_29 = arith.constant dense<0.000000e+00> : vector<128x32xf32>
    %42 = tpu.matmul %40, %41, %cst_29 {dimension_numbers = #tpu.dot_dimension_numbers<[1], [0], [0], [1], [0, 0, 1, 1], [], []>} : vector<128x16xbf16>, vector<16x32xbf16>, vector<128x32xf32> -> vector<128x32xf32>
    %43 = arith.mulf %42, %16 : vector<128x32xf32>
    %44 = vector.extract_strided_slice %43 {offsets = [0, 0], sizes = [64, 32], strides = [1, 1]} : vector<128x32xf32> to vector<64x32xf32>
    %45 = vector.extract_strided_slice %43 {offsets = [64, 0], sizes = [64, 32], strides = [1, 1]} : vector<128x32xf32> to vector<64x32xf32>
    %46 = arith.addf %44, %45 : vector<64x32xf32>
    %47 = vector.extract_strided_slice %46 {offsets = [0, 0], sizes = [32, 32], strides = [1, 1]} : vector<64x32xf32> to vector<32x32xf32>
    %48 = vector.extract_strided_slice %46 {offsets = [32, 0], sizes = [32, 32], strides = [1, 1]} : vector<64x32xf32> to vector<32x32xf32>
    %49 = arith.addf %47, %48 : vector<32x32xf32>
    %50 = vector.extract_strided_slice %49 {offsets = [0, 0], sizes = [16, 32], strides = [1, 1]} : vector<32x32xf32> to vector<16x32xf32>
    %51 = vector.extract_strided_slice %49 {offsets = [16, 0], sizes = [16, 32], strides = [1, 1]} : vector<32x32xf32> to vector<16x32xf32>
    %52 = arith.addf %50, %51 : vector<16x32xf32>
    %53 = arith.truncf %52 : vector<16x32xf32> to vector<16x32xbf16>
    %cst_30 = arith.constant dense<0.000000e+00> : vector<16x32xf32>
    %54 = tpu.matmul %53, %6, %cst_30 {dimension_numbers = #tpu.dot_dimension_numbers<[1], [0], [0], [1], [0, 0, 1, 1], [], []>} : vector<16x32xbf16>, vector<32x32xbf16>, vector<16x32xf32> -> vector<16x32xf32>
    %55 = vector.broadcast %9 : vector<1x32xf32> to vector<16x32xf32>
    %56 = arith.addf %54, %55 : vector<16x32xf32>
    %57 = arith.addf %56, %2 : vector<16x32xf32>
    %cst_31 = arith.constant dense<0.000000e+00> : vector<16xf32>
    %58 = vector.multi_reduction <add>, %57, %cst_31 [1] : vector<16x32xf32> to vector<16xf32>
    %59 = vector.shape_cast %58 : vector<16xf32> to vector<16x1xf32>
    %cst_32 = arith.constant 3.200000e+01 : f32
    %60 = vector.broadcast %cst_32 : f32 to vector<16x1xf32>
    %61 = arith.divf %59, %60 : vector<16x1xf32>
    %62 = vector.broadcast %61 : vector<16x1xf32> to vector<16x32xf32>
    %63 = arith.subf %57, %62 : vector<16x32xf32>
    %64 = arith.mulf %63, %63 : vector<16x32xf32>
    %cst_33 = arith.constant dense<0.000000e+00> : vector<16xf32>
    %65 = vector.multi_reduction <add>, %64, %cst_33 [1] : vector<16x32xf32> to vector<16xf32>
    %66 = vector.shape_cast %65 : vector<16xf32> to vector<16x1xf32>
    %cst_34 = arith.constant 3.200000e+01 : f32
    %67 = vector.broadcast %cst_34 : f32 to vector<16x1xf32>
    %68 = arith.divf %66, %67 : vector<16x1xf32>
    %69 = vector.broadcast %61 : vector<16x1xf32> to vector<16x32xf32>
    %70 = arith.subf %57, %69 : vector<16x32xf32>
    %cst_35 = arith.constant 9.99999974E-6 : f32
    %71 = vector.broadcast %cst_35 : f32 to vector<16x1xf32>
    %72 = arith.addf %68, %71 : vector<16x1xf32>
    %73 = math.rsqrt %72 : vector<16x1xf32>
    %74 = vector.broadcast %73 : vector<16x1xf32> to vector<16x32xf32>
    %75 = arith.mulf %70, %74 : vector<16x32xf32>
    %76 = vector.broadcast %10 : vector<1x32xf32> to vector<16x32xf32>
    %77 = arith.mulf %75, %76 : vector<16x32xf32>
    %78 = vector.broadcast %11 : vector<1x32xf32> to vector<16x32xf32>
    %79 = arith.addf %77, %78 : vector<16x32xf32>
    %80 = arith.truncf %79 : vector<16x32xf32> to vector<16x32xbf16>
    %cst_36 = arith.constant dense<0.000000e+00> : vector<16x128xf32>
    %81 = tpu.matmul %80, %7, %cst_36 {dimension_numbers = #tpu.dot_dimension_numbers<[1], [0], [0], [1], [0, 0, 1, 1], [], []>} : vector<16x32xbf16>, vector<32x128xbf16>, vector<16x128xf32> -> vector<16x128xf32>
    %82 = vector.broadcast %15 : vector<1x128xf32> to vector<16x128xf32>
    %83 = arith.addf %81, %82 : vector<16x128xf32>
    %cst_37 = arith.constant 0.000000e+00 : f32
    %84 = vector.broadcast %cst_37 : f32 to vector<16x128xf32>
    %85 = arith.maximumf %83, %84 : vector<16x128xf32>
    %86 = arith.truncf %85 : vector<16x128xf32> to vector<16x128xbf16>
    %cst_38 = arith.constant dense<0.000000e+00> : vector<16x32xf32>
    %87 = tpu.matmul %86, %8, %cst_38 {dimension_numbers = #tpu.dot_dimension_numbers<[1], [1], [0], [0], [0, 0, 1, 0], [], []>} : vector<16x128xbf16>, vector<32x128xbf16>, vector<16x32xf32> -> vector<16x32xf32>
    %88 = vector.broadcast %14 : vector<1x32xf32> to vector<16x32xf32>
    %89 = arith.addf %87, %88 : vector<16x32xf32>
    %90 = arith.addf %89, %79 : vector<16x32xf32>
    %cst_39 = arith.constant dense<0.000000e+00> : vector<16xf32>
    %91 = vector.multi_reduction <add>, %90, %cst_39 [1] : vector<16x32xf32> to vector<16xf32>
    %92 = vector.shape_cast %91 : vector<16xf32> to vector<16x1xf32>
    %cst_40 = arith.constant 3.200000e+01 : f32
    %93 = vector.broadcast %cst_40 : f32 to vector<16x1xf32>
    %94 = arith.divf %92, %93 : vector<16x1xf32>
    %95 = vector.broadcast %94 : vector<16x1xf32> to vector<16x32xf32>
    %96 = arith.subf %90, %95 : vector<16x32xf32>
    %97 = arith.mulf %96, %96 : vector<16x32xf32>
    %cst_41 = arith.constant dense<0.000000e+00> : vector<16xf32>
    %98 = vector.multi_reduction <add>, %97, %cst_41 [1] : vector<16x32xf32> to vector<16xf32>
    %99 = vector.shape_cast %98 : vector<16xf32> to vector<16x1xf32>
    %cst_42 = arith.constant 3.200000e+01 : f32
    %100 = vector.broadcast %cst_42 : f32 to vector<16x1xf32>
    %101 = arith.divf %99, %100 : vector<16x1xf32>
    %102 = vector.broadcast %94 : vector<16x1xf32> to vector<16x32xf32>
    %103 = arith.subf %90, %102 : vector<16x32xf32>
    %cst_43 = arith.constant 9.99999974E-6 : f32
    %104 = vector.broadcast %cst_43 : f32 to vector<16x1xf32>
    %105 = arith.addf %101, %104 : vector<16x1xf32>
    %106 = math.rsqrt %105 : vector<16x1xf32>
    %107 = vector.broadcast %106 : vector<16x1xf32> to vector<16x32xf32>
    %108 = arith.mulf %103, %107 : vector<16x32xf32>
    %109 = vector.broadcast %12 : vector<1x32xf32> to vector<16x32xf32>
    %110 = arith.mulf %108, %109 : vector<16x32xf32>
    %111 = vector.broadcast %13 : vector<1x32xf32> to vector<16x32xf32>
    %112 = arith.addf %110, %111 : vector<16x32xf32>
    %c0_44 = arith.constant 0 : index
    %c0_45 = arith.constant 0 : index
    %113 = vector.load %arg6[%c0_44, %c0_45] : memref<16x32xf32, #tpu.memory_space<vmem>>, vector<16x32xf32>
    tpu.vector_store %arg6[%c0_44, %c0_45], %112 {strides = array<i32>} : memref<16x32xf32, #tpu.memory_space<vmem>>, vector<16x32xf32>,
    return
  }
}

</mosaic_0001>

<bundles_post_ra>
// kernel: transformer_block.1
= control target key start
LH: loop header
LB: loop body
LE: loop exit
PB: predicated region body
PF: predicated region fallthrough
CT: control target
= control target key end

     0   :  { %s1482_s0 = inlined_call_operand.vmem [shape: f32[16,32], index: 0, kind: input, shape index: {}]   ;;  %s1483_s1 = inlined_call_operand.vmem [shape: f32[16,32], index: 1, kind: input, shape index: {}]   ;;  %s1484_s2 = inlined_call_operand.vmem [shape: f32[16,32], index: 2, kind: input, shape index: {}]   ;;  %s1485_s3 = inlined_call_operand.vmem [shape: bf16[192,128], index: 3, kind: input, shape index: {}]   ;;  %s1486_s4 = inlined_call_operand.vmem [shape: f32[8,128], index: 4, kind: input, shape index: {}]   ;;  %s1487_s5 = inlined_call_operand.vmem [shape: f32[256,32], index: 5, kind: input, shape index: {}]   ;;  %s1488_s6 = inlined_call_operand.hbm [shape: f32[16,32], index: 6, kind: output, shape index: {}]  }
   0x1   :  { %v870_v0 = vld [vmem:[%s1485_s3 + $0x18] sm:$0xff]  ;;  %v869_v1 = vld [vmem:[%s1485_s3 + $0x10] sm:$0xff]  ;;  %v868_v2 = vld [vmem:[%s1485_s3 + $0x8] sm:$0xff] }
   0x2   :  { %v25_v3 = vld [vmem:[%s1482_s0] sm:$0xff]  ;;  %v26_v4 = vld [vmem:[%s1482_s0 + $0x8] sm:$0xff]  ;;  %147 = vmatpush.bf16.msra.mxu1 %v870_v0  ;;  %117 = vmatpush.bf16.msra.mxu0 %v868_v2 }
   0x3   :  { %v867_v5 = vld [vmem:[%s1485_s3] sm:$0xff]  ;;  %v28_v7 = vld [vmem:[%s1483_s1 + $0x8] sm:$0xff] }
   0x4   :  { %v27_v6 = vld [vmem:[%s1483_s1] sm:$0xff] }
   0x5   :  { %11 = vsyncpa [#allocation3], 0  ;;  %v125_v8 = vpack.c.bf16 %v26_v4, %v25_v3  ;;  %v94_v9 = vpack.c.bf16 %v28_v7, %v27_v6  ;;  %vm107_vm0 = vcmask 261120   ;;  %v1060_v15 = vld [vmem:[%s1487_s5 + $0x8] sm:$0xff]  ;;  %v1071_v18 = vld [vmem:[%s1487_s5] sm:$0xff]  ;;  %vm286_vm1 = vcmask 130048  }
   0x6   :  { %148 = vmatpush.bf16.msra.mxu1 %v869_v1  ;;  %118 = vmatpush.bf16.msra.mxu0 %v867_v5  ;;  %v1065_v16 = vld [vmem:[%s1487_s5 + $0x28] sm:$0xff]  ;;  %v1076_v19 = vld [vmem:[%s1487_s5 + $0x20] sm:$0xff]  ;;  %v1087_v26 = vld [vmem:[%s1487_s5 + $0x18] sm:$0xff]  ;;  %s993_s27 = smov [#allocation2]   ;;  %s786_s30 = sshll.u32 %s1488_s6, 4  ;;  %s787_s30 = int_to_ptr.hbm [resolvable:$true] %s786_s30 }
   0x7   :  { %v1092_v27 = vld [vmem:[%s1487_s5 + $0x38] sm:$0xff]  ;;  %v1097_v28 = vld [vmem:[%s1487_s5 + $0x10] sm:$0xff]  ;;  %v1113_v36 = vld [vmem:[%s1487_s5 + $0x48] sm:$0xff]  ;;  %s784_s28 = sshll.u32 %s993_s27, 4  ;;  %s995_s7 = smov 8   ;;  %s785_s28 = int_to_ptr.vmem [resolvable:$true] %s784_s28 }
   0x8   :  { %v1102_v29 = vld [vmem:[%s1487_s5 + $0x30] sm:$0xff]  ;;  %v1118_v37 = vld [vmem:[%s1487_s5 + $0x40] sm:$0xff]  ;;  %v1126_v41 = vld [vmem:[%s1487_s5 + $0x58] sm:$0xff] }
   0x9   :  { %815 = vmatmul.msk.bf16.vlgmr.msra.gmra.mxu1 %vm107_vm0, %v125_v8  ;;  %806 = vmatmul.msk.bf16.vlgmr.msra.gmra.mxu0 %vm107_vm0, %v94_v9  ;;  %v1131_v42 = vld [vmem:[%s1487_s5 + $0x50] sm:$0xff]  ;;  %v1139_v46 = vld [vmem:[%s1487_s5 + $0x68] sm:$0xff]  ;;  %v1144_v47 = vld [vmem:[%s1487_s5 + $0x60] sm:$0xff] }
   0xa   :  { %v1152_v51 = vld [vmem:[%s1487_s5 + $0x78] sm:$0xff]  ;;  %v1157_v52 = vld [vmem:[%s1487_s5 + $0x70] sm:$0xff]  ;;  %v78_v56 = vld [vmem:[%s1487_s5 + $0x80] sm:$0xff] }
   0xb   :  { %v79_v61 = vld [vmem:[%s1487_s5 + $0x88] sm:$0xff]  ;;  %v82_v1 = vld [vmem:[%s1487_s5 + $0xa0] sm:$0xff]  ;;  %v80_v3 = vld [vmem:[%s1487_s5 + $0x90] sm:$0xff] }
  0x86   :  { %v150_v10 = vpop.f32.mrf.mxu1  ;;  %v120_v11 = vpop.f32.mrf.mxu0 }
  0x87   :  { %v185_v22 = vmul.f32 %v120_v11, %v1071_v18  ;;  %v189_v23 = vmul.f32 %v120_v11, %v1076_v19  ;;  %v187_v32 = vmul.f32 %v120_v11, %v1097_v28  ;;  %v191_v33 = vmul.f32 %v120_v11, %v1102_v29 }
  0x88   :  { %v193_v39 = vmul.f32 %v120_v11, %v1118_v37  ;;  %v195_v44 = vmul.f32 %v120_v11, %v1131_v42  ;;  %v197_v49 = vmul.f32 %v120_v11, %v1144_v47  ;;  %v199_v54 = vmul.f32 %v120_v11, %v1157_v52 }
  0x8e   :  { %v152_v12 = vpop.f32.mrf.mxu1  ;;  %v122_v14 = vpop.f32.mrf.mxu0 }
  0x8f   :  { %v209_v13 = vpack.c.bf16 %v152_v12, %v150_v10  ;;  %v186_v20 = vmul.f32 %v122_v14, %v1060_v15  ;;  %v190_v21 = vmul.f32 %v122_v14, %v1065_v16  ;;  %v188_v30 = vmul.f32 %v122_v14, %v1087_v26  ;;  %v81_v10 = vld [vmem:[%s1487_s5 + $0x98] sm:$0xff] }
  0x90   :  { %v192_v31 = vmul.f32 %v122_v14, %v1092_v27  ;;  %v194_v38 = vmul.f32 %v122_v14, %v1113_v36  ;;  %v196_v43 = vmul.f32 %v122_v14, %v1126_v41  ;;  %v198_v48 = vmul.f32 %v122_v14, %v1139_v46 }
  0x91   :  { %v235_v17 = vsel %vm107_vm0, %v209_v13, 0  ;;  %v201_v24 = vpack.c.bf16 %v186_v20, %v185_v22  ;;  %v203_v25 = vpack.c.bf16 %v190_v21, %v189_v23  ;;  %v202_v34 = vpack.c.bf16 %v188_v30, %v187_v32  ;;  %v84_v22 = vld [vmem:[%s1487_s5 + $0xb0] sm:$0xff] }
  0x92   :  { %244 = vmatpush.bf16.xpose.msrb.mxu1 %v235_v17  ;;  %879 = vmatpush.bf16.xpose.msra.mxu3 %v235_v17  ;;  %v204_v35 = vpack.c.bf16 %v192_v31, %v191_v33  ;;  %v205_v40 = vpack.c.bf16 %v194_v38, %v193_v39  ;;  %v206_v45 = vpack.c.bf16 %v196_v43, %v195_v44  ;;  %v88_v31 = vld [vmem:[%s1487_s5 + $0xd0] sm:$0xff]  ;;  %v872_v43 = vld [vmem:[%s1485_s3 + $0x28] sm:$0xff]  ;;  %v90_v44 = vld [vmem:[%s1487_s5 + $0xe0] sm:$0xff] }
  0x93   :  { %v207_v50 = vpack.c.bf16 %v198_v48, %v197_v49  ;;  %v200_v53 = vmul.f32 %v122_v14, %v1152_v51  ;;  %v83_v14 = vld [vmem:[%s1487_s5 + $0xa8] sm:$0xff]  ;;  %177 = vmatpush.bf16.msra.mxu2 %v872_v43  ;;  %v86_v43 = vld [vmem:[%s1487_s5 + $0xc0] sm:$0xff] }
  0x95   :  { %v208_v55 = vpack.c.bf16 %v200_v53, %v199_v54  ;;  %v85_v53 = vld [vmem:[%s1487_s5 + $0xb8] sm:$0xff]  ;;  %v91_v54 = vld [vmem:[%s1487_s5 + $0xe8] sm:$0xff] }
  0x99   :  { %825 = vmatmul.msk.bf16.vlgmr.msrb.gmra.mxu1 %vm107_vm0, %v201_v24  ;;  %827 = vmatmul.msk.bf16.vlgmr.msra.gmra.mxu3 %vm107_vm0, %v203_v25 }
  0xa9   :  { %826 = vmatmul.msk.bf16.gmra.mxu1 %vm107_vm0, %v202_v34  ;;  %828 = vmatmul.msk.bf16.gmra.mxu3 %vm107_vm0, %v204_v35  ;;  %v89_v35 = vld [vmem:[%s1487_s5 + $0xd8] sm:$0xff] }
  0xb9   :  { %829 = vmatmul.msk.bf16.gmra.mxu3 %vm107_vm0, %v205_v40 }
  0xc9   :  { %830 = vmatmul.msk.bf16.gmra.mxu3 %vm107_vm0, %v206_v45  ;;  %v871_v45 = vld [vmem:[%s1485_s3 + $0x20] sm:$0xff] }
  0xca   :  { %178 = vmatpush.bf16.msra.mxu2 %v871_v45 }
  0xd9   :  { %831 = vmatmul.msk.bf16.gmra.mxu3 %vm107_vm0, %v207_v50 }
  0xe9   :  { %832 = vmatmul.msk.bf16.gmra.mxu3 %vm107_vm0, %v208_v55 }
 0x116   :  { %v246_v57 = vpop.f32.mrf.mxu1 }
 0x117   :  { %v1165_v58 = vadd.f32 %v246_v57, %v78_v56 }
 0x119   :  { %v287_v59 = vsel %vm286_vm1, %v1165_v58, -inf }
 0x11a   :  { %288 = vmax.xlane.f32.xlu0 %v287_v59 }
 0x11c   :  { %v256_v60 = vpop.f32.mrf.mxu3 }
 0x11d   :  { %v1182_v4 = vadd.f32 %v256_v60, %v82_v1 }
 0x11e   :  { %v248_v62 = vpop.f32.mrf.mxu1 }
 0x11f   :  { %v1172_v63 = vadd.f32 %v248_v62, %v79_v61  ;;  %v299_v8 = vsel %vm286_vm1, %v1182_v4, -inf  ;;  %v92_v61 = vld [vmem:[%s1487_s5 + $0xf0] sm:$0xff] }
 0x121   :  { %v290_v0 = vsel %vm286_vm1, %v1172_v63, -inf }
 0x122   :  { %291 = vmax.xlane.f32.xlu0 %v290_v0 }
 0x124   :  { %v258_v2 = vpop.f32.mrf.mxu3 }
 0x125   :  { %v1200_v20 = vadd.f32 %v258_v2, %v83_v14  ;;  %v87_v2 = vld [vmem:[%s1487_s5 + $0xc8] sm:$0xff] }
 0x126   :  { %v251_v5 = vpop.f32.mrf.mxu1 }
 0x127   :  { %v1184_v6 = vadd.f32 %v251_v5, %v80_v3  ;;  %v302_v21 = vsel %vm286_vm1, %v1200_v20, -inf  ;;  %v1267_v3 = vld [vmem:[%s1484_s2] sm:$0xff]  ;;  %v1272_v5 = vld [vmem:[%s1484_s2 + $0x8] sm:$0xff] }
 0x129   :  { %v293_v7 = vsel %vm286_vm1, %v1184_v6, -inf }
 0x12a   :  { %294 = vmax.xlane.f32.xlu1 %v293_v7  ;;  %300 = vmax.xlane.f32.xlu0 %v299_v8  ;;  %v155_v7 = vpack.c.bf16 %v1272_v5, %v1267_v3 }
 0x12c   :  { %v261_v9 = vpop.f32.mrf.mxu3  ;;  %824 = vmatmul.msk.bf16.vlgmr.msra.gmra.mxu2 %vm107_vm0, %v155_v7 }
 0x12d   :  { %v1209_v24 = vadd.f32 %v261_v9, %v84_v22 }
 0x12e   :  { %v253_v11 = vpop.f32.mrf.mxu1 }
 0x12f   :  { %v1193_v12 = vadd.f32 %v253_v11, %v81_v10  ;;  %v305_v25 = vsel %vm286_vm1, %v1209_v24, -inf }
 0x131   :  { %v296_v13 = vsel %vm286_vm1, %v1193_v12, -inf }
 0x132   :  { %297 = vmax.xlane.f32.xlu1 %v296_v13 }
 0x134   :  { %v263_v17 = vpop.f32.mrf.mxu3 }
 0x135   :  { %v1246_v55 = vadd.f32 %v263_v17, %v85_v53 }
 0x137   :  { %v308_v59 = vsel %vm286_vm1, %v1246_v55, -inf }
 0x13a   :  { %303 = vmax.xlane.f32.xlu1 %v302_v21 }
 0x13c   :  { %v1207_v23 = vpop.f32.mrf.mxu3 }
 0x142   :  { %306 = vmax.xlane.f32.xlu1 %v305_v25 }
 0x144   :  { %v268_v30 = vpop.f32.mrf.mxu3 }
 0x145   :  { %v1276_v8 = vadd.f32 %v268_v30, %v87_v2  ;;  %v93_v30 = vld [vmem:[%s1487_s5 + $0xf8] sm:$0xff] }
 0x147   :  { %v314_v9 = vsel %vm286_vm1, %v1276_v8, -inf }
 0x14c   :  { %v271_v32 = vpop.f32.mrf.mxu3 }
 0x14d   :  { %v1216_v33 = vadd.f32 %v271_v32, %v88_v31 }
 0x14f   :  { %v317_v34 = vsel %vm286_vm1, %v1216_v33, -inf }
 0x150   :  { %318 = vmax.xlane.f32.xlu2 %v317_v34 }
 0x154   :  { %v273_v38 = vpop.f32.mrf.mxu3 }
 0x155   :  { %v1223_v39 = vadd.f32 %v273_v38, %v89_v35 }
 0x157   :  { %v320_v40 = vsel %vm286_vm1, %v1223_v39, -inf }
 0x158   :  { %321 = vmax.xlane.f32.xlu2 %v320_v40 }
 0x15c   :  { %v276_v48 = vpop.f32.mrf.mxu3 }
 0x15d   :  { %v1236_v49 = vadd.f32 %v276_v48, %v90_v44  ;;  %v1303_v44 = vadd.f32 %v1207_v23, %v86_v43 }
 0x15f   :  { %v323_v50 = vsel %vm286_vm1, %v1236_v49, -inf }
 0x160   :  { %324 = vmax.xlane.f32.xlu2 %v323_v50 }
 0x164   :  { %v278_v56 = vpop.f32.mrf.mxu3 }
 0x165   :  { %v1248_v57 = vadd.f32 %v278_v56, %v91_v54 }
 0x167   :  { %v326_v60 = vsel %vm286_vm1, %v1248_v57, -inf }
 0x168   :  { %309 = vmax.xlane.f32.xlu2 %v308_v59  ;;  %327 = vmax.xlane.f32.xlu0 %v326_v60  ;;  %v311_v59 = vsel %vm286_vm1, %v1303_v44, -inf }
 0x16c   :  { %v281_v62 = vpop.f32.mrf.mxu3 }
 0x16d   :  { %v1257_v0 = vadd.f32 %v281_v62, %v92_v61 }
 0x16f   :  { %v329_v1 = vsel %vm286_vm1, %v1257_v0, -inf }
 0x170   :  { %330 = vmax.xlane.f32.xlu2 %v329_v1 }
 0x174   :  { %v283_v31 = vpop.f32.mrf.mxu3 }
 0x175   :  { %v1290_v32 = vadd.f32 %v283_v31, %v93_v30 }
 0x177   :  { %v332_v38 = vsel %vm286_vm1, %v1290_v32, -inf }
 0x178   :  { %315 = vmax.xlane.f32.xlu2 %v314_v9 }
 0x18d   :  { %v289_v10 = vpop.xlane.xlu0 %288 }
 0x18e   :  { %v335_v11 = vsub.f32 %v1165_v58, %v289_v10 }
 0x190   :  { %v351_v13 = vmul.f32 1.442695, %v335_v11 }
 0x192   :  { %892 = vpow2.f32 %v351_v13 }
 0x195   :  { %v292_v14 = vpop.xlane.xlu0 %291 }
 0x196   :  { %v336_v17 = vsub.f32 %v1172_v63, %v292_v14 }
 0x198   :  { %v1283_v21 = vpop.eup %892  ;;  %v353_v22 = vmul.f32 1.442695, %v336_v17 }
 0x199   :  { %v383_v25 = vsel %vm286_vm1, %v1283_v21, 0.0 }
 0x19a   :  { %894 = vpow2.f32 %v353_v22  ;;  %384 = vadd.xlane.f32.xlu0 %v383_v25 }
 0x19d   :  { %v295_v58 = vpop.xlane.xlu1 %294 }
 0x19e   :  { %v337_v34 = vsub.f32 %v1184_v6, %v295_v58  ;;  %v301_v6 = vpop.xlane.xlu0 %300 }
 0x19f   :  { %v339_v53 = vsub.f32 %v1182_v4, %v301_v6 }
 0x1a0   :  { %v1293_v35 = vpop.eup %894  ;;  %v355_v63 = vmul.f32 1.442695, %v337_v34 }
 0x1a1   :  { %v386_v40 = vsel %vm286_vm1, %v1293_v35, 0.0  ;;  %v359_v23 = vmul.f32 1.442695, %v339_v53 }
 0x1a2   :  { %896 = vpow2.f32 %v355_v63  ;;  %333 = vmax.xlane.f32.xlu0 %v332_v38  ;;  %387 = vadd.xlane.f32.xlu1 %v386_v40 }
 0x1a5   :  { %v298_v45 = vpop.xlane.xlu1 %297 }
 0x1a6   :  { %v338_v48 = vsub.f32 %v1193_v12, %v298_v45 }
 0x1a8   :  { %v1306_v50 = vpop.eup %896  ;;  %v357_v54 = vmul.f32 1.442695, %v338_v48 }
 0x1a9   :  { %v389_v56 = vsel %vm286_vm1, %v1306_v50, 0.0 }
 0x1aa   :  { %898 = vpow2.f32 %v357_v54  ;;  %390 = vadd.xlane.f32.xlu0 %v389_v56  ;;  %312 = vmax.xlane.f32.xlu1 %v311_v59 }
 0x1ab   :  { %900 = vpow2.f32 %v359_v23 }
 0x1ad   :  { %v304_v62 = vpop.xlane.xlu1 %303 }
 0x1ae   :  { %v340_v7 = vsub.f32 %v1200_v20, %v304_v62 }
 0x1b0   :  { %v1313_v60 = vpop.eup %898  ;;  %v361_v10 = vmul.f32 1.442695, %v340_v7 }
 0x1b1   :  { %v392_v12 = vsel %vm286_vm1, %v1313_v60, 0.0  ;;  %v1317_v61 = vpop.eup %900 }
 0x1b2   :  { %393 = vadd.xlane.f32.xlu1 %v392_v12  ;;  %v395_v4 = vsel %vm286_vm1, %v1317_v61, 0.0 }
 0x1b5   :  { %v307_v11 = vpop.xlane.xlu1 %306 }
 0x1b6   :  { %v341_v22 = vsub.f32 %v1209_v24, %v307_v11 }
 0x1ba   :  { %396 = vadd.xlane.f32.xlu1 %v395_v4 }
 0x1c3   :  { %v319_v1 = vpop.xlane.xlu2 %318 }
 0x1c4   :  { %v345_v2 = vsub.f32 %v1216_v33, %v319_v1  ;;  %v363_v33 = vmul.f32 1.442695, %v341_v22 }
 0x1c6   :  { %v371_v9 = vmul.f32 1.442695, %v345_v2 }
 0x1c8   :  { %902 = vpow2.f32 %v371_v9 }
 0x1c9   :  { %904 = vpow2.f32 %v361_v10 }
 0x1cb   :  { %v322_v13 = vpop.xlane.xlu2 %321 }
 0x1cc   :  { %v346_v14 = vsub.f32 %v1223_v39, %v322_v13  ;;  %v180_v13 = vpop.f32.mrf.mxu2 }
 0x1ce   :  { %v1324_v17 = vpop.eup %902  ;;  %v373_v25 = vmul.f32 1.442695, %v346_v14 }
 0x1cf   :  { %v413_v30 = vsel %vm286_vm1, %v1324_v17, 0.0  ;;  %v1329_v31 = vpop.eup %904 }
 0x1d0   :  { %906 = vpow2.f32 %v373_v25  ;;  %414 = vadd.xlane.f32.xlu2 %v413_v30  ;;  %v398_v63 = vsel %vm286_vm1, %v1329_v31, 0.0 }
 0x1d1   :  { %908 = vpow2.f32 %v363_v33 }
 0x1d3   :  { %v325_v20 = vpop.xlane.xlu2 %324 }
 0x1d4   :  { %v347_v58 = vsub.f32 %v1236_v49, %v325_v20  ;;  %v182_v14 = vpop.f32.mrf.mxu2 }
 0x1d5   :  { %v471_v22 = vpack.c.bf16 %v182_v14, %v180_v13 }
 0x1d6   :  { %v1332_v34 = vpop.eup %906  ;;  %v375_v39 = vmul.f32 1.442695, %v347_v58 }
 0x1d7   :  { %v416_v24 = vsel %vm286_vm1, %v1332_v34, 0.0  ;;  %v1338_v43 = vpop.eup %908  ;;  %503 = vmatpush.bf16.msrb.mxu0 %v471_v22  ;;  %880 = vmatpush.bf16.msrb.mxu2 %v471_v22 }
 0x1d8   :  { %910 = vpow2.f32 %v375_v39  ;;  %399 = vadd.xlane.f32.xlu2 %v398_v63  ;;  %417 = vadd.xlane.f32.xlu0 %v416_v24  ;;  %v401_v54 = vsel %vm286_vm1, %v1338_v43, 0.0 }
 0x1db   :  { %v310_v38 = vpop.xlane.xlu2 %309  ;;  %v328_v40 = vpop.xlane.xlu0 %327 }
 0x1dc   :  { %v342_v6 = vsub.f32 %v1246_v55, %v310_v38  ;;  %v348_v49 = vsub.f32 %v1248_v57, %v328_v40 }
 0x1de   :  { %v1342_v45 = vpop.eup %910  ;;  %v365_v48 = vmul.f32 1.442695, %v342_v6  ;;  %v377_v53 = vmul.f32 1.442695, %v348_v49 }
 0x1df   :  { %v419_v56 = vsel %vm286_vm1, %v1342_v45, 0.0 }
 0x1e0   :  { %912 = vpow2.f32 %v365_v48  ;;  %402 = vadd.xlane.f32.xlu2 %v401_v54  ;;  %420 = vadd.xlane.f32.xlu0 %v419_v56 }
 0x1e1   :  { %914 = vpow2.f32 %v377_v53 }
 0x1e3   :  { %v331_v59 = vpop.xlane.xlu2 %330 }
 0x1e4   :  { %v349_v23 = vsub.f32 %v1257_v0, %v331_v59 }
 0x1e6   :  { %v1349_v55 = vpop.eup %912  ;;  %v379_v57 = vmul.f32 1.442695, %v349_v23 }
 0x1e7   :  { %v1351_v12 = vpop.eup %914  ;;  %v404_v4 = vsel %vm286_vm1, %v1349_v55, 0.0 }
 0x1e8   :  { %916 = vpow2.f32 %v379_v57  ;;  %405 = vadd.xlane.f32.xlu0 %v404_v4  ;;  %v422_v62 = vsel %vm286_vm1, %v1351_v12, 0.0 }
 0x1e9   :  { %423 = vadd.xlane.f32.xlu1 %v422_v62 }
 0x1eb   :  { %v316_v1 = vpop.xlane.xlu2 %315 }
 0x1ec   :  { %v344_v2 = vsub.f32 %v1276_v8, %v316_v1 }
 0x1ee   :  { %v1358_v7 = vpop.eup %916  ;;  %v369_v0 = vmul.f32 1.442695, %v344_v2 }
 0x1ef   :  { %v425_v9 = vsel %vm286_vm1, %v1358_v7, 0.0 }
 0x1f0   :  { %918 = vpow2.f32 %v369_v0 }
 0x1f1   :  { %426 = vadd.xlane.f32.xlu1 %v425_v9 }
 0x1f6   :  { %v1362_v10 = vpop.eup %918 }
 0x1f7   :  { %v410_v11 = vsel %vm286_vm1, %v1362_v10, 0.0 }
 0x1f9   :  { %411 = vadd.xlane.f32.xlu1 %v410_v11 }
 0x20d   :  { %v385_v8 = vpop.xlane.xlu0 %384 }
 0x20e   :  { %920 = vrcp.f32 %v385_v8 }
 0x214   :  { %v921_v58 = vpop.eup %920 }
 0x215   :  { %v388_v25 = vpop.xlane.xlu1 %387  ;;  %v334_v30 = vpop.xlane.xlu0 %333  ;;  %v447_v63 = vmul.f32 %v921_v58, %v1283_v21 }
 0x216   :  { %922 = vrcp.f32 %v388_v25  ;;  %v350_v33 = vsub.f32 %v1290_v32, %v334_v30 }
 0x218   :  { %v381_v20 = vmul.f32 1.442695, %v350_v33 }
 0x21a   :  { %924 = vpow2.f32 %v381_v20 }
 0x21c   :  { %v923_v39 = vpop.eup %922 }
 0x21d   :  { %v448_v24 = vmul.f32 %v923_v39, %v1293_v35  ;;  %v313_v38 = vpop.xlane.xlu1 %312  ;;  %v391_v53 = vpop.xlane.xlu0 %390 }
 0x21e   :  { %v343_v40 = vsub.f32 %v1303_v44, %v313_v38 }
 0x21f   :  { %v463_v6 = vpack.c.bf16 %v448_v24, %v447_v63 }
 0x220   :  { %v1370_v49 = vpop.eup %924  ;;  %v367_v48 = vmul.f32 1.442695, %v343_v40 }
 0x221   :  { %833 = vmatmul.msk.bf16.vlgmr.msrb.gmra.mxu0 %vm286_vm1, %v463_v6  ;;  %v428_v32 = vsel %vm286_vm1, %v1370_v49, 0.0 }
 0x222   :  { %926 = vpow2.f32 %v367_v48  ;;  %429 = vadd.xlane.f32.xlu2 %v428_v32 }
 0x223   :  { %928 = vrcp.f32 %v391_v53 }
 0x225   :  { %v394_v54 = vpop.xlane.xlu1 %393 }
 0x226   :  { %930 = vrcp.f32 %v394_v54 }
 0x228   :  { %v1375_v21 = vpop.eup %926 }
 0x229   :  { %v407_v35 = vsel %vm286_vm1, %v1375_v21, 0.0  ;;  %v929_v44 = vpop.eup %928 }
 0x22a   :  { %408 = vadd.xlane.f32.xlu0 %v407_v35  ;;  %v449_v59 = vmul.f32 %v929_v44, %v1306_v50 }
 0x22c   :  { %v931_v56 = vpop.eup %930 }
 0x22d   :  { %v450_v23 = vmul.f32 %v931_v56, %v1313_v60  ;;  %v397_v62 = vpop.xlane.xlu1 %396 }
 0x22e   :  { %932 = vrcp.f32 %v397_v62 }
 0x22f   :  { %v464_v57 = vpack.c.bf16 %v450_v23, %v449_v59 }
 0x231   :  { %834 = vmatmul.msk.bf16.gmra.mxu0 %vm286_vm1, %v464_v57 }
 0x234   :  { %v933_v0 = vpop.eup %932 }
 0x235   :  { %v451_v50 = vmul.f32 %v933_v0, %v1317_v61 }
 0x243   :  { %v415_v4 = vpop.xlane.xlu2 %414 }
 0x244   :  { %934 = vrcp.f32 %v415_v4  ;;  %v874_v4 = vld [vmem:[%s1485_s3 + $0x38] sm:$0xff] }
 0x245   :  { %598 = vmatpush.bf16.msra.mxu1 %v874_v4 }
 0x24a   :  { %v935_v9 = vpop.eup %934 }
 0x24b   :  { %v400_v1 = vpop.xlane.xlu2 %399  ;;  %v418_v2 = vpop.xlane.xlu0 %417  ;;  %v457_v22 = vmul.f32 %v935_v9, %v1324_v17 }
 0x24c   :  { %936 = vrcp.f32 %v400_v1 }
 0x24d   :  { %938 = vrcp.f32 %v418_v2 }
 0x252   :  { %v937_v11 = vpop.eup %936 }
 0x253   :  { %v939_v13 = vpop.eup %938  ;;  %v421_v14 = vpop.xlane.xlu0 %420  ;;  %v452_v60 = vmul.f32 %v937_v11, %v1329_v31 }
 0x254   :  { %v458_v8 = vmul.f32 %v939_v13, %v1332_v34  ;;  %v403_v33 = vpop.xlane.xlu2 %402 }
 0x255   :  { %v465_v25 = vpack.c.bf16 %v452_v60, %v451_v50  ;;  %940 = vrcp.f32 %v403_v33 }
 0x256   :  { %v468_v30 = vpack.c.bf16 %v458_v8, %v457_v22  ;;  %942 = vrcp.f32 %v421_v14 }
 0x257   :  { %835 = vmatmul.msk.bf16.gmra.mxu0 %vm286_vm1, %v465_v25 }
 0x258   :  { %838 = vmatmul.msk.bf16.vlgmr.msrb.gmra.mxu2 %vm286_vm1, %v468_v30 }
 0x25b   :  { %v406_v20 = vpop.xlane.xlu0 %405  ;;  %v941_v61 = vpop.eup %940 }
 0x25c   :  { %v424_v58 = vpop.xlane.xlu1 %423  ;;  %944 = vrcp.f32 %v406_v20  ;;  %v943_v39 = vpop.eup %942  ;;  %v453_v17 = vmul.f32 %v941_v61, %v1338_v43 }
 0x25d   :  { %946 = vrcp.f32 %v424_v58  ;;  %v459_v24 = vmul.f32 %v943_v39, %v1342_v45 }
 0x262   :  { %v945_v31 = vpop.eup %944 }
 0x263   :  { %v947_v63 = vpop.eup %946  ;;  %v454_v34 = vmul.f32 %v945_v31, %v1349_v55 }
 0x264   :  { %v460_v38 = vmul.f32 %v947_v63, %v1351_v12  ;;  %v427_v48 = vpop.xlane.xlu1 %426 }
 0x265   :  { %v466_v40 = vpack.c.bf16 %v454_v34, %v453_v17  ;;  %948 = vrcp.f32 %v427_v48 }
 0x266   :  { %v469_v6 = vpack.c.bf16 %v460_v38, %v459_v24 }
 0x267   :  { %836 = vmatmul.msk.bf16.gmra.mxu0 %vm286_vm1, %v466_v40 }
 0x268   :  { %839 = vmatmul.msk.bf16.gmra.mxu2 %vm286_vm1, %v469_v6 }
 0x26b   :  { %v949_v54 = vpop.eup %948 }
 0x26c   :  { %v412_v32 = vpop.xlane.xlu1 %411  ;;  %v461_v55 = vmul.f32 %v949_v54, %v1358_v7 }
 0x295   :  { %v430_v53 = vpop.xlane.xlu2 %429 }
 0x296   :  { %950 = vrcp.f32 %v430_v53 }
 0x297   :  { %952 = vrcp.f32 %v412_v32 }
 0x29c   :  { %v951_v35 = vpop.eup %950 }
 0x29d   :  { %v409_v43 = vpop.xlane.xlu0 %408  ;;  %v462_v45 = vmul.f32 %v951_v35, %v1370_v49  ;;  %v953_v44 = vpop.eup %952 }
 0x29e   :  { %954 = vrcp.f32 %v409_v43  ;;  %v456_v23 = vmul.f32 %v953_v44, %v1362_v10  ;;  %v505_v7 = vpop.f32.mrf.mxu0  ;;  %v873_v10 = vld [vmem:[%s1485_s3 + $0x30] sm:$0xff] }
 0x29f   :  { %v470_v12 = vpack.c.bf16 %v462_v45, %v461_v55  ;;  %599 = vmatpush.bf16.msra.mxu1 %v873_v10  ;;  %v545_v25 = vmul.f32 %v505_v7, %v1071_v18 }
 0x2a1   :  { %840 = vmatmul.msk.bf16.gmra.mxu2 %vm286_vm1, %v470_v12 }
 0x2a4   :  { %v955_v56 = vpop.eup %954 }
 0x2a5   :  { %v455_v59 = vmul.f32 %v955_v56, %v1375_v21  ;;  %v992_v56 = vmov 32.0  }
 0x2a6   :  { %v507_v49 = vpop.f32.mrf.mxu0  ;;  %956 = vrcp.f32 %v992_v56 }
 0x2a7   :  { %v467_v57 = vpack.c.bf16 %v456_v23, %v455_v59 }
 0x2a9   :  { %837 = vmatmul.msk.bf16.gmra.mxu0 %vm286_vm1, %v467_v57  ;;  %v876_v57 = vld [vmem:[%s1485_s3 + $0x48] sm:$0xff] }
 0x2aa   :  { %688 = vmatpush.bf16.msra.mxu2 %v876_v57 }
 0x2ac   :  { %v957_v59 = vpop.eup %956 }
 0x2ad   :  { %v615_v23 = vmul.f32 32.0, %v957_v59  ;;  %vm619_vm2 = vweird.f32 %v957_v59 }
 0x2ae   :  { %v510_v62 = vpop.f32.mrf.mxu0 }
 0x2af   :  { %v616_v4 = vsub.f32 1.0, %v615_v23 }
 0x2b6   :  { %v512_v1 = vpop.f32.mrf.mxu0 }
 0x2d4   :  { %v515_v0 = vpop.f32.mrf.mxu0 }
 0x2d5   :  { %v549_v20 = vmul.f32 %v515_v0, %v1076_v19  ;;  %v548_v19 = vmul.f32 %v512_v1, %v1087_v26 }
 0x2db   :  { %v530_v2 = vpop.f32.mrf.mxu2 }
 0x2dc   :  { %v517_v11 = vpop.f32.mrf.mxu0  ;;  %v555_v58 = vmul.f32 %v530_v2, %v1131_v42 }
 0x2dd   :  { %v550_v42 = vmul.f32 %v517_v11, %v1065_v16  ;;  %v885_v16 = vld [vmem:[%s1486_s4] ss:$0 sm:$0xff] }
 0x2e3   :  { %v532_v9 = vpop.f32.mrf.mxu2 }
 0x2e4   :  { %v520_v21 = vpop.f32.mrf.mxu0  ;;  %v556_v61 = vmul.f32 %v532_v9, %v1126_v41 }
 0x2e5   :  { %v551_v39 = vmul.f32 %v520_v21, %v1102_v29 }
 0x2e6   :  { %v564_v40 = vadd.f32 %v556_v61, %v548_v19  ;;  %v886_v19 = vld [vmem:[%s1486_s4 + $0x1] ss:$0 sm:$0xff] }
 0x2eb   :  { %v535_v13 = vpop.f32.mrf.mxu2 }
 0x2ec   :  { %v522_v50 = vpop.f32.mrf.mxu0  ;;  %v557_v30 = vmul.f32 %v535_v13, %v1144_v47  ;;  %v546_v47 = vmul.f32 %v507_v49, %v1060_v15 }
 0x2ed   :  { %v552_v63 = vmul.f32 %v522_v50, %v1092_v27 }
 0x2ee   :  { %v565_v41 = vadd.f32 %v557_v30, %v549_v20 }
 0x2f3   :  { %v537_v14 = vpop.f32.mrf.mxu2 }
 0x2f4   :  { %v558_v17 = vmul.f32 %v537_v14, %v1139_v46 }
 0x2f6   :  { %v566_v46 = vadd.f32 %v558_v17, %v550_v42 }
 0x324   :  { %v540_v60 = vpop.f32.mrf.mxu2 }
 0x325   :  { %v559_v33 = vmul.f32 %v540_v60, %v1157_v52  ;;  %v547_v52 = vmul.f32 %v510_v62, %v1097_v28 }
 0x326   :  { %v525_v22 = vpop.f32.mrf.mxu0 }
 0x327   :  { %v553_v8 = vmul.f32 %v525_v22, %v1118_v37  ;;  %v567_v24 = vadd.f32 %v559_v33, %v551_v39  ;;  %v563_v27 = vadd.f32 %v555_v58, %v547_v52  ;;  %v875_v22 = vld [vmem:[%s1485_s3 + $0x40] sm:$0xff] }
 0x328   :  { %689 = vmatpush.bf16.msra.mxu2 %v875_v22 }
 0x329   :  { %v561_v37 = vadd.f32 %v553_v8, %v545_v25 }
 0x32b   :  { %v569_v6 = vadd.f32 %v565_v41, %v561_v37 }
 0x32c   :  { %v542_v31 = vpop.f32.mrf.mxu2 }
 0x32d   :  { %v560_v18 = vmul.f32 %v542_v31, %v1152_v51  ;;  %v571_v51 = vadd.f32 %v567_v24, %v563_v27  ;;  %v887_v24 = vld [vmem:[%s1486_s4 + $0x2] ss:$0 sm:$0xff] }
 0x32e   :  { %v527_v34 = vpop.f32.mrf.mxu0 }
 0x32f   :  { %v568_v29 = vadd.f32 %v560_v18, %v552_v63  ;;  %v554_v38 = vmul.f32 %v527_v34, %v1113_v36  ;;  %v573_v32 = vadd.f32 %v571_v51, %v569_v6  ;;  %v877_v51 = vld [vmem:[%s1485_s3 + $0x50] sm:$0xff] }
 0x331   :  { %v562_v48 = vadd.f32 %v554_v38, %v546_v47  ;;  %v572_v53 = vadd.f32 %v568_v29, %v564_v40 }
 0x333   :  { %v570_v15 = vadd.f32 %v566_v46, %v562_v48  ;;  %v878_v48 = vld [vmem:[%s1485_s3 + $0x58] sm:$0xff] }
 0x334   :  { %718 = vmatpush.bf16.xpose.msrb.mxu1 %v878_v48 }
 0x335   :  { %v574_v28 = vadd.f32 %v572_v53, %v570_v15  ;;  %v888_v15 = vld [vmem:[%s1486_s4 + $0x6] ss:$0 sm:$0xff] }
 0x337   :  { %v575_v54 = vpack.c.bf16 %v574_v28, %v573_v32 }
 0x339   :  { %849 = vmatmul.msk.bf16.vlgmr.msra.gmra.mxu1 %vm107_vm0, %v575_v54 }
 0x33c   :  { %719 = vmatpush.bf16.xpose.msrb.mxu1 %v877_v51 }
 0x3b6   :  { %v601_v26 = vpop.f32.mrf.mxu1 }
 0x3b7   :  { %v602_v35 = vadd.f32 %v885_v16, %v601_v26 }
 0x3b9   :  { %v606_v36 = vadd.f32 %v602_v35, %v1267_v3  ;;  %v617_v3 = vmul.f32 %v957_v59, %v616_v4 }
 0x3bb   :  { %v608_v43 = vsel %vm107_vm0, %v606_v36, 0.0  ;;  %v618_v7 = vadd.f32 %v957_v59, %v617_v3 }
 0x3bc   :  { %609 = vadd.xlane.f32.xlu2 %v608_v43 }
 0x3bd   :  { %v1433_v49 = vsel %vm619_vm2, %v957_v59, %v618_v7 }
 0x3be   :  { %v603_v55 = vpop.f32.mrf.mxu1 }
 0x3bf   :  { %v604_v45 = vadd.f32 %v885_v16, %v603_v55 }
 0x3c1   :  { %v607_v12 = vadd.f32 %v604_v45, %v1272_v5 }
 0x3c3   :  { %v611_v44 = vsel %vm107_vm0, %v607_v12, 0.0 }
 0x3c4   :  { %612 = vadd.xlane.f32.xlu0 %v611_v44 }
 0x42f   :  { %v610_v62 = vpop.xlane.xlu2 %609 }
 0x430   :  { %v621_v5 = vmul.f32 %v1433_v49, %v610_v62 }
 0x432   :  { %v623_v1 = vsub.f32 %v606_v36, %v621_v5  ;;  %v889_v36 = vld [vmem:[%s1486_s4 + $0x5] ss:$0 sm:$0xff] }
 0x434   :  { %v625_v2 = vmul.f32 %v623_v1, %v623_v1 }
 0x436   :  { %v627_v0 = vsel %vm107_vm0, %v625_v2, 0.0 }
 0x437   :  { %v613_v9 = vpop.xlane.xlu0 %612  ;;  %628 = vadd.xlane.f32.xlu1 %v627_v0 }
 0x438   :  { %v622_v11 = vmul.f32 %v1433_v49, %v613_v9 }
 0x43a   :  { %v624_v13 = vsub.f32 %v607_v12, %v622_v11 }
 0x43c   :  { %v626_v21 = vmul.f32 %v624_v13, %v624_v13 }
 0x43e   :  { %v630_v10 = vsel %vm107_vm0, %v626_v21, 0.0 }
 0x43f   :  { %631 = vadd.xlane.f32.xlu2 %v630_v10 }
 0x4aa   :  { %v629_v14 = vpop.xlane.xlu1 %628 }
 0x4ab   :  { %v633_v50 = vmul.f32 %v629_v14, %v1433_v49 }
 0x4ad   :  { %v635_v60 = vadd.f32 1e-05, %v633_v50 }
 0x4af   :  { %958 = vrsqrt.f32 %v635_v60  ;;  %vm643_vm4 = vweird.f32 %v635_v60 }
 0x4b2   :  { %v632_v8 = vpop.xlane.xlu2 %631 }
 0x4b3   :  { %v634_v25 = vmul.f32 %v632_v8, %v1433_v49 }
 0x4b5   :  { %v959_v30 = vpop.eup %958  ;;  %v636_v33 = vadd.f32 1e-05, %v634_v25 }
 0x4b6   :  { %v638_v20 = vmul.f32 %v959_v30, %v635_v60  ;;  %vm644_vm3 = vweird.f32 %v959_v30 }
 0x4b7   :  { %960 = vrsqrt.f32 %v636_v33  ;;  %vm645_vm5 = vmor %vm643_vm4, %vm644_vm3  ;;  %vm653_vm7 = vweird.f32 %v636_v33 }
 0x4b8   :  { %v639_v58 = vmul.f32 %v959_v30, %v638_v20 }
 0x4ba   :  { %v640_v61 = vmul.f32 0.5, %v639_v58 }
 0x4bc   :  { %v641_v39 = vsub.f32 1.5, %v640_v61  ;;  %v890_v61 = vld [vmem:[%s1486_s4 + $0x3] ss:$0 sm:$0xff] }
 0x4bd   :  { %v961_v31 = vpop.eup %960 }
 0x4be   :  { %v642_v63 = vmul.f32 %v959_v30, %v641_v39  ;;  %v648_v17 = vmul.f32 %v961_v31, %v636_v33  ;;  %vm654_vm6 = vweird.f32 %v961_v31 }
 0x4bf   :  { %vm655_vm8 = vmor %vm653_vm7, %vm654_vm6 }
 0x4c0   :  { %v649_v37 = vmul.f32 %v961_v31, %v648_v17  ;;  %v646_v18 = vsel %vm645_vm5, %v959_v30, %v642_v63  ;;  %v891_v63 = vld [vmem:[%s1486_s4 + $0x4] ss:$0 sm:$0xff]  ;;  %s994_s4 = smov 128  }
 0x4c1   :  { %v657_v42 = vmul.f32 %v646_v18, %v623_v1 }
 0x4c2   :  { %v650_v47 = vmul.f32 0.5, %v649_v37 }
 0x4c3   :  { %v660_v29 = vmul.f32 %v886_v19, %v657_v42 }
 0x4c4   :  { %v651_v52 = vsub.f32 1.5, %v650_v47 }
 0x4c5   :  { %v663_v40 = vadd.f32 %v887_v24, %v660_v29 }
 0x4c6   :  { %v652_v34 = vmul.f32 %v961_v31, %v651_v52 }
 0x4c8   :  { %v656_v41 = vsel %vm655_vm8, %v961_v31, %v652_v34 }
 0x4c9   :  { %v658_v38 = vmul.f32 %v656_v41, %v624_v13 }
 0x4cb   :  { %v661_v27 = vmul.f32 %v886_v19, %v658_v38 }
 0x4cd   :  { %v664_v46 = vadd.f32 %v887_v24, %v661_v27 }
 0x4cf   :  { %v665_v6 = vpack.c.bf16 %v664_v46, %v663_v40 }
 0x4d1   :  { %858 = vmatmul.msk.bf16.vlgmr.msra.gmra.mxu2 %vm107_vm0, %v665_v6 }
 0x554   :  { %v691_v53 = vpop.f32.mrf.mxu2 }
 0x555   :  { %v692_v32 = vadd.f32 %v888_v15, %v691_v53 }
 0x557   :  { %v696_v16 = vmax.f32 %v692_v32, 0.0 }
 0x55c   :  { %v693_v28 = vpop.f32.mrf.mxu2 }
 0x55d   :  { %v694_v54 = vadd.f32 %v888_v15, %v693_v28 }
 0x55f   :  { %v697_v26 = vmax.f32 %v694_v54, 0.0 }
 0x561   :  { %v698_v35 = vpack.c.bf16 %v697_v26, %v696_v16 }
 0x563   :  { %720 = vmatmul.bf16.vlgmr.msrb.gmra.mxu1 %v698_v35 }
 0x5e0   :  { %v721_v43 = vpop.f32.mrf.mxu1 }
 0x5e1   :  { %v722_v55 = vadd.f32 %v889_v36, %v721_v43 }
 0x5e3   :  { %v726_v45 = vadd.f32 %v722_v55, %v663_v40 }
 0x5e5   :  { %v728_v12 = vsel %vm107_vm0, %v726_v45, 0.0 }
 0x5e6   :  { %729 = vadd.xlane.f32.xlu0 %v728_v12 }
 0x5e8   :  { %v723_v44 = vpop.f32.mrf.mxu1 }
 0x5e9   :  { %v724_v56 = vadd.f32 %v889_v36, %v723_v44 }
 0x5eb   :  { %v727_v59 = vadd.f32 %v724_v56, %v664_v46 }
 0x5ed   :  { %v731_v23 = vsel %vm107_vm0, %v727_v59, 0.0 }
 0x5ee   :  { %732 = vadd.xlane.f32.xlu1 %v731_v23 }
 0x659   :  { %v730_v57 = vpop.xlane.xlu0 %729 }
 0x65a   :  { %v734_v4 = vmul.f32 %v730_v57, %v1433_v49 }
 0x65c   :  { %v736_v3 = vsub.f32 %v726_v45, %v734_v4 }
 0x65e   :  { %v738_v7 = vmul.f32 %v736_v3, %v736_v3 }
 0x660   :  { %v740_v62 = vsel %vm107_vm0, %v738_v7, 0.0 }
 0x661   :  { %v733_v5 = vpop.xlane.xlu1 %732  ;;  %741 = vadd.xlane.f32.xlu2 %v740_v62 }
 0x662   :  { %v735_v1 = vmul.f32 %v733_v5, %v1433_v49 }
 0x664   :  { %v737_v2 = vsub.f32 %v727_v59, %v735_v1 }
 0x666   :  { %v739_v0 = vmul.f32 %v737_v2, %v737_v2 }
 0x668   :  { %v743_v9 = vsel %vm107_vm0, %v739_v0, 0.0 }
 0x669   :  { %744 = vadd.xlane.f32.xlu0 %v743_v9 }
 0x6d4   :  { %v742_v11 = vpop.xlane.xlu2 %741 }
 0x6d5   :  { %v746_v13 = vmul.f32 %v742_v11, %v1433_v49 }
 0x6d7   :  { %v748_v21 = vadd.f32 1e-05, %v746_v13 }
 0x6d9   :  { %962 = vrsqrt.f32 %v748_v21  ;;  %vm756_vm10 = vweird.f32 %v748_v21 }
 0x6dc   :  { %v745_v10 = vpop.xlane.xlu0 %744 }
 0x6dd   :  { %v747_v14 = vmul.f32 %v745_v10, %v1433_v49 }
 0x6df   :  { %v963_v50 = vpop.eup %962  ;;  %v749_v60 = vadd.f32 1e-05, %v747_v14 }
 0x6e0   :  { %v751_v22 = vmul.f32 %v963_v50, %v748_v21  ;;  %vm757_vm9 = vweird.f32 %v963_v50 }
 0x6e1   :  { %964 = vrsqrt.f32 %v749_v60  ;;  %vm758_vm11 = vmor %vm756_vm10, %vm757_vm9  ;;  %vm766_vm13 = vweird.f32 %v749_v60 }
 0x6e2   :  { %v752_v8 = vmul.f32 %v963_v50, %v751_v22 }
 0x6e4   :  { %v753_v25 = vmul.f32 0.5, %v752_v8 }
 0x6e6   :  { %v754_v30 = vsub.f32 1.5, %v753_v25 }
 0x6e7   :  { %v965_v33 = vpop.eup %964 }
 0x6e8   :  { %v755_v20 = vmul.f32 %v963_v50, %v754_v30  ;;  %v761_v58 = vmul.f32 %v965_v33, %v749_v60  ;;  %vm767_vm12 = vweird.f32 %v965_v33 }
 0x6e9   :  { %vm768_vm14 = vmor %vm766_vm13, %vm767_vm12 }
 0x6ea   :  { %v759_v39 = vsel %vm758_vm11, %v963_v50, %v755_v20  ;;  %v762_v31 = vmul.f32 %v965_v33, %v761_v58 }
 0x6eb   :  { %v770_v49 = vmul.f32 %v759_v39, %v736_v3 }
 0x6ec   :  { %v763_v17 = vmul.f32 0.5, %v762_v31 }
 0x6ed   :  { %v773_v37 = vmul.f32 %v890_v61, %v770_v49 }
 0x6ee   :  { %v764_v18 = vsub.f32 1.5, %v763_v17 }
 0x6ef   :  { %v776_v47 = vadd.f32 %v891_v63, %v773_v37 }
 0x6f0   :  { %v765_v52 = vmul.f32 %v965_v33, %v764_v18 }
 0x6f1   :  { %778 = vst.msk [vmem:[#allocation2] sm:$0xff] %vm107_vm0, %v776_v47 }
 0x6f2   :  { %v769_v19 = vsel %vm768_vm14, %v965_v33, %v765_v52 }
 0x6f3   :  { %v771_v42 = vmul.f32 %v769_v19, %v737_v2 }
 0x6f5   :  { %v774_v34 = vmul.f32 %v890_v61, %v771_v42 }
 0x6f7   :  { %v777_v41 = vadd.f32 %v891_v63, %v774_v34 }
 0x6f9   :  { %779 = vst.msk [vmem:[#allocation2 + $0x8] sm:$0xff] %vm107_vm0, %v777_v41 }
 0x6fa   :  { %792 = dma.vmem_to_hbm [thread:$0]  %s785_s28, 256, %s787_s30, [#allocation3], %s994_s4, %s994_s4, %s995_s7  }
 0x6fb   :  { %990 = dma.done.wait [#allocation3], 256  }
 0x6fc   :  { %991 = vsyncadd [#allocation3], 4294967040 }
 0x6fd   :  { %797 = vsyncpa [#allocation3], 1 }

</bundles_post_ra>
